<compile_context>
chip_gen: v6e
topology: v6e:2x2x1
jax: 0.10.0
libtpu: 0.0.40
codegen_flags: <defaults>
</compile_context>

<pallas_src>
import jax
import jax.numpy as jnp
from jax.experimental import pallas as pl
from jax.experimental.pallas import tpu as pltpu


def _swish_kernel(x_ref, o_ref):
    """Exact swish on one (tr, C) VMEM tile: x * sigmoid(x), f32 math."""
    x = x_ref[...].astype(jnp.float32)
    o_ref[...] = (x * jax.nn.sigmoid(x)).astype(o_ref.dtype)


def _swish_kernel_approx(x_ref, o_ref):
    """EUP-friendly swish: exp on EUP, approx reciprocal instead of f32 divide."""
    x = x_ref[...].astype(jnp.float32)
    z = jnp.exp(-x)                                   # EUP
    o_ref[...] = (x * pl.reciprocal(1.0 + z, approx=True)).astype(o_ref.dtype)


def swish(x, *, target_block_bytes=4 << 20, min_grid_steps=8, approx=False):
    """Swish activation via a single Pallas TPU kernel call.

    Any shape/dtype. Lane-aligned last dims (multiple of 128) take a
    zero-copy path; other shapes fall back to flatten + zero-pad
    (swish(0) == 0, so padding is safe).
    """
    orig_shape = x.shape
    orig_dtype = x.dtype
    n = x.size
    if n == 0:
        return x

    itemsize = jnp.dtype(orig_dtype).itemsize
    sublane = 8 * max(1, 4 // itemsize)          # 8 (f32) / 16 (bf16) / 32 (int8)

    # ---- Build a lane-dense 2-D view -------------------------------------
    last = orig_shape[-1] if x.ndim >= 1 else 1
    aligned = (
        x.ndim >= 1
        and last % 128 == 0
        and last * itemsize * sublane <= (8 << 20)   # keep min block sane for huge rows
    )
    if aligned:
        cols = last
        rows = n // cols
        x2d = x.reshape(rows, cols)                  # free reshape, no copy
        padded = False
        total = n
    else:
        flat = x.reshape(-1)
        cols = min(1024, 128 * pl.cdiv(n, 128))      # lane-dense, never wider than needed
        rows = pl.cdiv(n, cols)
        total = rows * cols
        padded = total != n
        if padded:
            flat = jnp.pad(flat, (0, total - n))     # only for unaligned shapes
        x2d = flat.reshape(rows, cols)

    # ---- Pick the row-tile size ------------------------------------------
    # Target ~target_block_bytes per buffer, but guarantee >= min_grid_steps
    # grid steps for mid-sized tensors (dual-TC sharding + pipeline overlap).
    row_bytes = cols * itemsize
    tr = max(sublane, target_block_bytes // row_bytes)
    if rows > sublane * min_grid_steps:
        tr = min(tr, max(sublane, rows // min_grid_steps))
    if tr >= rows:
        tr = rows                                    # single full-extent block (tiny input)
    else:
        tr = max(sublane, (tr // sublane) * sublane)  # sublane-aligned tile

    grid = (pl.cdiv(rows, tr),)                      # ragged last block is fine (elementwise)

    kernel = _swish_kernel_approx if approx else _swish_kernel

    out2d = pl.pallas_call(
        kernel,
        out_shape=jax.ShapeDtypeStruct((rows, cols), orig_dtype),
        grid=grid,
        in_specs=[pl.BlockSpec((tr, cols), lambda i: (i, 0))],
        out_specs=pl.BlockSpec((tr, cols), lambda i: (i, 0)),
        compiler_params=pltpu.CompilerParams(
            dimension_semantics=("parallel",),
            vmem_limit_bytes=48 * 1024 * 1024,       # fits v7x (64 MiB) and lifts v5e's 16 MiB default
        ),
    )(x2d)

    if aligned:
        return out2d.reshape(orig_shape)
    out = out2d.reshape(-1)
    if padded:
        out = out[:n]
    return out.reshape(orig_shape)


def _swish_reference(x):
    return x * jax.nn.sigmoid(x)


if __name__ == "__main__":
    key = jax.random.PRNGKey(0)
    k1, k2, k3 = jax.random.split(key, 3)

    # Small shape consistent with the module's use inside a Conformer block
    # (batch=2, seq=8, hidden=32) -> exercises the unaligned fallback path.
    x_small = jax.random.normal(k1, (2, 8, 32), dtype=jnp.float32)
    # Lane-aligned shape -> zero-copy path, multi-step grid.
    x_aligned = jax.random.normal(k2, (4, 384, 512), dtype=jnp.float32)
    # Lane-aligned with a ragged last row block -> exercises boundary masking.
    x_ragged = jax.random.normal(k3, (3, 375, 512), dtype=jnp.float32)

    for x in (x_small, x_aligned, x_ragged):
        y = jax.block_until_ready(swish(x))
        y_ref = _swish_reference(x)
        assert y.shape == x.shape, (y.shape, x.shape)
        assert y.dtype == x.dtype, (y.dtype, x.dtype)
        err = float(jnp.max(jnp.abs(y - y_ref)))
        assert err < 1e-5, err

    print("KERNEL_OK")
</pallas_src>

<mosaic_0001>
module attributes {stable_mosaic.version = 11 : i64} {
  func.func @_swish_kernel(%arg0: i32, %arg1: memref<1x512xf32, #tpu.memory_space<vmem>>, %arg2: memref<1x512xf32, #tpu.memory_space<vmem>>) attributes {dimension_semantics = [#tpu.dimension_semantics<parallel>], iteration_bounds = array<i64: 1>, scalar_prefetch = 0 : i64, scratch_operands = 0 : i64, tpu.core_type = #tpu.core_type<tc>, window_params = [{transform_indices = @transform_0, window_bounds = array<i64: 1, 512>}, {transform_indices = @transform_1, window_bounds = array<i64: 1, 512>}]} {
    %c0 = arith.constant 0 : index
    %c0_0 = arith.constant 0 : index
    %0 = vector.load %arg1[%c0, %c0_0] : memref<1x512xf32, #tpu.memory_space<vmem>>, vector<1x512xf32>
    %1 = arith.negf %0 : vector<1x512xf32>
    %2 = math.exp %1 : vector<1x512xf32>
    %cst = arith.constant 1.000000e+00 : f32
    %3 = vector.broadcast %cst : f32 to vector<1x512xf32>
    %4 = arith.addf %3, %2 : vector<1x512xf32>
    %5 = arith.divf %3, %4 : vector<1x512xf32>
    %6 = arith.mulf %0, %5 : vector<1x512xf32>
    %c0_1 = arith.constant 0 : index
    %c0_2 = arith.constant 0 : index
    %7 = vector.load %arg2[%c0_1, %c0_2] : memref<1x512xf32, #tpu.memory_space<vmem>>, vector<1x512xf32>
    tpu.vector_store %arg2[%c0_1, %c0_2], %6 {strides = array<i32>} : memref<1x512xf32, #tpu.memory_space<vmem>>, vector<1x512xf32>,
    return
  }
  func.func @transform_0(%arg0: i32) -> (i32, i32) {
    %c0_i32 = arith.constant 0 : i32
    %c0_i32_0 = arith.constant 0 : i32
    return %arg0, %c0_i32 : i32, i32
  }
  func.func @transform_1(%arg0: i32) -> (i32, i32) {
    %c0_i32 = arith.constant 0 : i32
    %c0_i32_0 = arith.constant 0 : i32
    return %arg0, %c0_i32 : i32, i32
  }
}

</mosaic_0001>

<bundles_post_ra>
// kernel: tpu_custom_call.1
= control target key start
LH: loop header
LB: loop body
LE: loop exit
PB: predicated region body
PF: predicated region fallthrough
CT: control target
= control target key end

     0   :  { %6 = vsyncpa [#allocation3], 0  ;;  %s118_s0 = inlined_call_operand.hbm [shape: f32[1,512], index: 0, kind: input, shape index: {}]   ;;  %s119_s1 = inlined_call_operand.hbm [shape: f32[1,512], index: 1, kind: output, shape index: {}]  }
   0x1   :  { %7 = vsyncpa [#allocation4], 0  ;;  %s100_s6 = smov [#allocation2]  }
   0x2   :  { %s14_s7 = sshll.u32 %s100_s6, 4  ;;  %s15_s7 = int_to_ptr.vmem [resolvable:$true] %s14_s7 }
   0x3   :  { %s64_s8 = scalar_lea.vmem %s15_s7, 64  ;;  %p69_p1 = scmp.lt.s32.totalorder %s15_s7, %s15_s7 }
   0x4   :  { %p65_p0 = scmp.ne.s32.totalorder %s15_s7, %s64_s8  ;;  %p70_p2 = scmp.lt.s32.totalorder %s64_s8, %s64_s8 }
   0x6   :  { %p71_p3 = por %p70_p2, %p69_p1 }
   0x8   :  { %p72_p4 = pnand %p71_p3, %p65_p0 }
   0xa   :  { %75 = shalt.err (!%p72_p4)
}
   0xb   :  { %17 = dma.hbm_to_vmem [thread:$0]  %s118_s0, 64, %s15_s7, [#allocation3]  }
   0xc   :  { %96 = dma.done.wait [#allocation3], 64  }
   0xd   :  { %97 = vsyncadd [#allocation3], 4294967232  ;;  %v21_v0 = vld [vmem:[#allocation2] sm:$0xf]  ;;  %v29_v4 = vlaneseq  ;;  %s101_s11 = smov [#allocation5]  }
   0xe   :  { %v49_v1 = vmul.f32 -1.442695, %v21_v0  ;;  %s40_s12 = sshll.u32 %s101_s11, 4  ;;  %s41_s12 = int_to_ptr.vmem [resolvable:$true] %s40_s12 }
   0xf   :  { %vm31_vm0 = vcmp.lt.s32.totalorder %v29_v4, 512  ;;  %s76_s13 = scalar_lea.vmem %s41_s12, 64  ;;  %p81_p6 = scmp.lt.s32.totalorder %s41_s12, %s41_s12 }
  0x10   :  { %52 = vpow2.f32 %v49_v1  ;;  %p77_p5 = scmp.ne.s32.totalorder %s41_s12, %s76_s13  ;;  %p82_p7 = scmp.lt.s32.totalorder %s76_s13, %s76_s13 }
  0x12   :  { %p83_p8 = por %p82_p7, %p81_p6 }
  0x14   :  { %p84_p9 = pnand %p83_p8, %p77_p5 }
  0x1d   :  { %v53_v2 = vpop.eup %52 }
  0x1e   :  { %v25_v3 = vadd.f32 1.0, %v53_v2 }
  0x20   :  { %54 = vrcp.f32 %v25_v3 }
  0x2d   :  { %v55_v5 = vpop.eup %54 }
  0x2e   :  { %v28_v6 = vmul.f32 %v55_v5, %v21_v0 }
  0x30   :  { %33 = vst.msk [vmem:[#allocation5] sm:$0xf] %vm31_vm0, %v28_v6 }
  0x31   :  { %87 = shalt.err (!%p84_p9)
}
  0x32   :  { %43 = dma.vmem_to_hbm [thread:$0]  %s41_s12, 64, %s119_s1, [#allocation4]  }
  0x33   :  { %98 = dma.done.wait [#allocation4], 64  }
  0x34   :  { %99 = vsyncadd [#allocation4], 4294967232 }
  0x35   :  { %47 = vsyncpa [#allocation3], 1 }
  0x36   :  { %48 = vsyncpa [#allocation4], 1 }

</bundles_post_ra>
